<compile_context>
chip_gen: v7x
topology: tpu7x:2x2x1
jax: 0.10.0
libtpu: 0.0.40
codegen_flags: <defaults>
</compile_context>

<pallas_src>
import jax
import jax.numpy as jnp
from jax.experimental import pallas as pl
from jax.experimental.pallas import tpu as pltpu


def _device_kind() -> str:
    try:
        return jax.devices()[0].device_kind.lower()
    except Exception:
        return ""


def _block_budget_bytes() -> int:
    """Per-chip (TH, W) f32 block budget."""
    kind = _device_kind()
    if "v5 lite" in kind or "v5e" in kind or "v5litepod" in kind:
        # v5e scoped-VMEM default is 16 MiB; keep 2 MiB blocks (4x buffered ~= 8 MiB).
        return 2 << 20
    # v6e (128 MiB VMEM) and v7x (64 MiB, 3.2 TB/s HBM): be aggressive, >= 4 MiB blocks.
    return 4 << 20


def _grid_semantics():
    """CORE_PARALLEL on v7x (2 TCs/chip) so the H grid axis is split across cores;
    plain 'parallel' elsewhere (near-zero codegen impact but harmless)."""
    kind = _device_kind()
    core_parallel = getattr(pltpu, "CORE_PARALLEL", None)
    if "v7" in kind and core_parallel is not None:
        return (core_parallel,)
    return ("parallel",)


def _choose_tile_h(half_h: int, w: int, budget_bytes: int) -> int:
    """Largest multiple-of-8 divisor of H//2 whose (TH, W) f32 block fits the budget.
    Returns 0 when H//2 has no multiple-of-8 divisor (caller uses the full-block path)."""
    if half_h % 8 != 0:
        return 0
    target = max(8, budget_bytes // (4 * w))
    if half_h <= target:
        return half_h
    best = 8
    d = 8
    while d <= target:
        if half_h % d == 0:
            best = d
        d += 8
    return best


def _make_prob_mask_kernel(slope: float, w: int):
    shift_w = w // 2
    half_slope = 0.5 * float(slope)

    def kernel(mask_ref, out_ref):
        # Cast folded into the kernel (no separate XLA cast pass over HBM).
        x = mask_ref[...].astype(jnp.float32)
        # sigmoid(slope*x) via the single-EUP tanh form (1 EUP push instead of 2).
        p = 0.5 * jnp.tanh(half_slope * x) + 0.5
        # fftshift along W = one XLU lane rotation; store stays lane-dense.
        out_ref[...] = pltpu.roll(p, shift=shift_w, axis=1)

    return kernel


def _make_full_block_kernel(slope: float, h: int, w: int):
    """Fallback for shapes where H//2 is not a multiple of 8: one full-array block,
    both fftshift rolls done in-kernel (sublane roll + lane roll)."""
    half_slope = 0.5 * float(slope)

    def kernel(mask_ref, out_ref):
        x = mask_ref[...].astype(jnp.float32)
        p = 0.5 * jnp.tanh(half_slope * x) + 0.5
        p = pltpu.roll(p, shift=h // 2, axis=0)
        out_ref[...] = pltpu.roll(p, shift=w // 2, axis=1)

    return kernel


def prob_mask_forward(mask_param: jax.Array, input_shape, slope: float = 5.0) -> jax.Array:
    """Pallas equivalent of ProbMask.forward.

    mask_param: learned logits with H*W elements (module stores them as (1, H, W)).
    input_shape: shape of the input tensor; only [-2] and [-1] are used.
    Returns: (1, H, W) float32 probability mask, fftshift-ed over the last two dims.
    """
    H = int(input_shape[-2])
    W = int(input_shape[-1])
    assert mask_param.size == H * W, "mask parameter must match input.shape[-2:]"
    # TODO(synk): odd H/W fftshift would need an element-granular (n//2 vs -(n//2)) roll;
    # the module's default kspace shapes (e.g. 320x320) are even.
    assert H % 2 == 0 and W % 2 == 0, "kernel assumes even H and W for fftshift"

    # TODO(synk): slope is baked in as a Python float; if it ever becomes a traced array,
    # pass it as an SMEM scalar instead of closing over it.
    mask_2d = mask_param.reshape(H, W)  # keep stored dtype; cast happens in-kernel.

    in_bytes = H * W * mask_2d.dtype.itemsize
    out_bytes = H * W * 4
    cost = pl.CostEstimate(
        flops=3 * H * W,
        transcendentals=H * W,
        bytes_accessed=in_bytes + out_bytes,
    )

    budget = _block_budget_bytes()
    half_h = H // 2
    tile_h = _choose_tile_h(half_h, W, budget)

    if tile_h == 0:
        # Full-array single block (block shape == array dims, so (8,128) is waived).
        block_bytes = H * W * 4
        vmem_limit = max(32 << 20, 4 * block_bytes + (8 << 20))
        out_hw = pl.pallas_call(
            _make_full_block_kernel(slope, H, W),
            out_shape=jax.ShapeDtypeStruct((H, W), jnp.float32),
            compiler_params=pltpu.CompilerParams(vmem_limit_bytes=vmem_limit),
            cost_estimate=cost,
        )(mask_2d)
        return out_hw.reshape(1, H, W)

    n_h = H // tile_h          # always even (tile_h divides H//2) -> >= 2 blocks,
    shift_blocks = n_h // 2    # so both the pipeline and a 2-core split stay balanced.

    block_bytes = tile_h * W * 4
    # in + out double-buffered, plus headroom for internal scratch.
    vmem_limit = max(32 << 20, 4 * block_bytes + (8 << 20))

    out_hw = pl.pallas_call(
        _make_prob_mask_kernel(slope, W),
        out_shape=jax.ShapeDtypeStruct((H, W), jnp.float32),
        grid=(n_h,),
        # Input index_map performs the H-axis fftshift as a free block permutation.
        in_specs=[pl.BlockSpec((tile_h, W), lambda i: ((i + shift_blocks) % n_h, 0))],
        out_specs=pl.BlockSpec((tile_h, W), lambda i: (i, 0)),
        compiler_params=pltpu.CompilerParams(
            dimension_semantics=_grid_semantics(),
            vmem_limit_bytes=vmem_limit,
        ),
        cost_estimate=cost,
    )(mask_2d)

    return out_hw.reshape(1, H, W)


def init_mask_param(key, shape, slope: float = 5.0, eps: float = 0.01,
                    preselect_ratio: float = 0.0) -> jax.Array:
    """Deterministic replica of ProbMask._slope_random_uniform (returns (1, H, W))."""
    H, W = shape
    temp = jax.random.uniform(key, (H, W), dtype=jnp.float32,
                              minval=eps, maxval=1.0 - eps)
    logits = -jnp.log(1.0 / temp - 1.0) / slope
    logits = logits.reshape(1, H, W)
    if preselect_ratio > 0:
        sub_h = int(H / preselect_ratio ** 0.5 / 2)
        sub_w = int(W / preselect_ratio ** 0.5 / 2)
        logits = logits.at[:, :sub_h, :sub_w].set(-jnp.inf)
        logits = logits.at[:, :sub_h, -sub_w:].set(-jnp.inf)
        logits = logits.at[:, -sub_h:, :sub_w].set(-jnp.inf)
        logits = logits.at[:, -sub_h:, -sub_w:].set(-jnp.inf)
    return logits


if __name__ == "__main__":
    key = jax.random.PRNGKey(0)
    k_mask, k_in = jax.random.split(key)

    # Small input whose last two dims define the kspace mask shape
    # (W chosen as a multiple of 128 for lane-dense stores).
    B, C, H, W = 2, 4, 16, 128
    x = jax.random.normal(k_in, (B, C, H, W), dtype=jnp.float32)

    slope = 5.0
    mask_param = init_mask_param(k_mask, (H, W), slope=slope)  # (1, H, W)

    out = prob_mask_forward(mask_param, x.shape, slope=slope)
    out = jax.block_until_ready(out)

    # Pure-JAX reference of the torch forward:
    # fftshift(sigmoid(slope * mask.view(1, H, W)), dim=[-2, -1]).
    ref = jnp.fft.fftshift(jax.nn.sigmoid(slope * mask_param.reshape(1, H, W)),
                           axes=(-2, -1))
    assert out.shape == (1, H, W)
    # Kernel uses the tanh form of sigmoid (single EUP op); agrees to f32 precision.
    assert jnp.allclose(out, ref, atol=1e-5, rtol=1e-5), float(jnp.abs(out - ref).max())

    print("KERNEL_OK")
</pallas_src>

<mosaic_0001>
module attributes {stable_mosaic.version = 11 : i64} {
  func.func @kernel(%arg0: i32, %arg1: memref<8x128xf32, #tpu.memory_space<vmem>>, %arg2: memref<8x128xf32, #tpu.memory_space<vmem>>) attributes {dimension_semantics = [#tpu.dimension_semantics<parallel>], iteration_bounds = array<i64: 2>, scalar_prefetch = 0 : i64, scratch_operands = 0 : i64, tpu.core_type = #tpu.core_type<tc>, window_params = [{transform_indices = @transform_0, window_bounds = array<i64: 8, 128>}, {transform_indices = @transform_1, window_bounds = array<i64: 8, 128>}]} {
    %c0 = arith.constant 0 : index
    %c0_0 = arith.constant 0 : index
    %0 = vector.load %arg1[%c0, %c0_0] : memref<8x128xf32, #tpu.memory_space<vmem>>, vector<8x128xf32>
    %cst = arith.constant 2.500000e+00 : f32
    %1 = vector.broadcast %cst : f32 to vector<8x128xf32>
    %2 = arith.mulf %1, %0 : vector<8x128xf32>
    %3 = math.tanh %2 : vector<8x128xf32>
    %cst_1 = arith.constant 5.000000e-01 : f32
    %4 = vector.broadcast %cst_1 : f32 to vector<8x128xf32>
    %5 = arith.mulf %4, %3 : vector<8x128xf32>
    %cst_2 = arith.constant 5.000000e-01 : f32
    %6 = vector.broadcast %cst_2 : f32 to vector<8x128xf32>
    %7 = arith.addf %5, %6 : vector<8x128xf32>
    %c64_i32 = arith.constant 64 : i32
    %8 = tpu.dynamic_rotate %7 by %c64_i32 dim 1 : vector<8x128xf32>, i32 -> vector<8x128xf32>
    %c0_3 = arith.constant 0 : index
    %c0_4 = arith.constant 0 : index
    %9 = vector.load %arg2[%c0_3, %c0_4] : memref<8x128xf32, #tpu.memory_space<vmem>>, vector<8x128xf32>
    tpu.vector_store %arg2[%c0_3, %c0_4], %8 {strides = array<i32>} : memref<8x128xf32, #tpu.memory_space<vmem>>, vector<8x128xf32>,
    return
  }
  func.func @transform_0(%arg0: i32) -> (i32, i32) {
    %c1_i32 = arith.constant 1 : i32
    %0 = arith.addi %arg0, %c1_i32 : i32
    %c2_i32 = arith.constant 2 : i32
    %c0_i32 = arith.constant 0 : i32
    %1 = arith.cmpi eq, %c2_i32, %c0_i32 : i32
    %c1_i32_0 = arith.constant 1 : i32
    %2 = arith.select %1, %c1_i32_0, %c2_i32 : i32
    %3 = arith.remsi %0, %2 : i32
    %c0_i32_1 = arith.constant 0 : i32
    %4 = arith.cmpi ne, %3, %c0_i32_1 : i32
    %c0_i32_2 = arith.constant 0 : i32
    %5 = arith.cmpi slt, %3, %c0_i32_2 : i32
    %c0_i32_3 = arith.constant 0 : i32
    %6 = arith.cmpi slt, %2, %c0_i32_3 : i32
    %7 = arith.xori %5, %6 : i1
    %8 = arith.andi %7, %4 : i1
    %9 = arith.addi %3, %2 : i32
    %10 = arith.select %8, %9, %3 : i32
    %c0_i32_4 = arith.constant 0 : i32
    %c0_i32_5 = arith.constant 0 : i32
    return %10, %c0_i32_4 : i32, i32
  }
  func.func @transform_1(%arg0: i32) -> (i32, i32) {
    %c0_i32 = arith.constant 0 : i32
    %c0_i32_0 = arith.constant 0 : i32
    return %arg0, %c0_i32 : i32, i32
  }
}

</mosaic_0001>

<bundles_post_ra>
// kernel: tpu_custom_call.1
= control target key start
LH: loop header
LB: loop body
LE: loop exit
PB: predicated region body
PF: predicated region fallthrough
CT: control target
= control target key end

     0   :  { %6 = vsyncpa [#allocation3], 0  ;;  %s706_s0 = inlined_call_operand.hbm [shape: f32[16,128], index: 0, kind: input, shape index: {}]   ;;  %s707_s1 = inlined_call_operand.hbm [shape: f32[16,128], index: 1, kind: output, shape index: {}]  }
   0x1   :  { %8 = vsyncpa [#allocation3 + $0x1], 0 }
   0x2   :  { %9 = vsyncpa [#allocation4], 0 }
   0x3   :  { %11 = vsyncpa [#allocation4 + $0x1], 0  ;;  %s505_s6 = smov 0   ;;  %s507_s7 = smov 0  }
   0x4   :  { %s509_s8 = smov 0   ;;  %s511_s9 = smov 0  }
   0x5   :  { %s513_s10 = smov 0   ;;  %s515_s11 = smov 0  }
   0x6   :  { %s517_s12 = smov 0  }
   0x7 LB: > { %s541_s13 = sadd.s32 4294967295, %s490_s12   ;;  %s276_s14 = sadd.s32 4294967294, %s490_s12   ;;  %s490_s12 = sphi %s517_s12, %s725_s12   ;;  %s486_s11 = sphi %s515_s11, %s724_s11   ;;  %s482_s10 = sphi %s513_s10, %s723_s10   ;;  %s478_s9 = sphi %s511_s9, %s722_s9   ;;  %s474_s8 = sphi %s509_s8, %s721_s8   ;;  %s470_s7 = sphi %s507_s7, %s720_s7   ;;  %s466_s6 = sphi %s505_s6, %s719_s6  }
   0x8   : > { %s545_s15 = sadd.s32 1, %s490_s12   ;;  %s50_s16 = sadd.s32 1, %s486_s11 }
   0x9   : > { %p22_p0 = scmp.lt.s32.totalorder %s545_s15, 0  ;;  %s23_s17 = ssub.s32 0, %s545_s15 }
   0xa   : > { %s277_s18 = smin.u32 %s23_s17, %s545_s15  ;;  %s34_s19 = sadd.s32 1, %s545_s15 }
   0xb   : > { %s25_s20 = sand.u32 1, %s277_s18   ;;  %p35_p1 = scmp.lt.s32.totalorder %s34_s19, 0 }
   0xc   : > { %s26_s21 = ssub.s32 0, %s25_s20  ;;  %s36_s22 = ssub.s32 0, %s34_s19 }
   0xd   : > { %s727_s21 = smov (!%p22_p0, %s26_s21), %s25_s20  ;;  %s280_s23 = smin.u32 %s36_s22, %s34_s19 }
   0xe   : > { %p57_p2 = scmp.ne.s32.totalorder %s486_s11, %s482_s10  ;;  %p279_p3 = scmp.lt.s32.totalorder %s727_s21, 0 }
   0xf   : > { %s32_s24 = sadd.s32 2, %s727_s21  ;;  %s38_s25 = sand.u32 1, %s280_s23  }
  0x10   : > { %p58_p4 = scmp.eq.s32.totalorder %s490_s12, 0  ;;  %s729_s24 = smov (!%p279_p3, %s32_s24), %s727_s21 }
  0x11   : > { %s39_s26 = ssub.s32 0, %s38_s25  ;;  %p63_p6 = scmp.ne.s32.totalorder %s482_s10, %s478_s9 }
  0x12   : > { %p557_p5 = por %p58_p4, %p57_p2  ;;  %s731_s26 = smov (!%p35_p1, %s39_s26), %s38_s25 }
  0x13   : > { %p64_p7 = scmp.eq.s32.totalorder %s541_s13, 0  ;;  %p282_p8 = scmp.lt.s32.totalorder %s731_s26, 0 }
  0x14   : > { %s45_s28 = sadd.s32 2, %s731_s26  ;;  %s73_s30 = ssub.s32 %s490_s12, %s545_s15 }
  0x15   : > { %p565_p9 = por %p64_p7, %p63_p6  ;;  %s733_s28 = smov (!%p282_p8, %s45_s28), %s731_s26 }
  0x16   : > { %p74_p10 = scmp.eq.s32.totalorder %s73_s30, 0  ;;  %s76_s2 = sadd.s32 1, %s474_s8 }
  0x17   : > { %s47_s3 = ssub.s32 %s729_s24, %s733_s28  ;;  %p86_p11 = scmp.ne.s32.totalorder %s474_s8, %s470_s7 }
  0x18   : > { %p48_p12 = scmp.eq.s32.totalorder %s47_s3, 0  ;;  %p87_p13 = scmp.eq.s32.totalorder %s541_s13, 1 }
  0x19   : > { %s577_s4 = scalar_select %p74_p10, %s474_s8, %s76_s2  }
  0x1a   : > { %s582_s5 = scalar_select %p48_p12, %s486_s11, %s50_s16  }
  0x1b   : > { %p584_p0 = por %p87_p13, %p86_p11  ;;  %p92_p1 = scmp.ne.s32.totalorder %s470_s7, %s466_s6 }
  0x1c   : > { %p93_p2 = scmp.eq.s32.totalorder %s276_s14, 1  ;;  %p309_p4 = scmp.lt.s32.totalorder %s490_s12, 2 }
  0x1d   : > { %s711_s9 = scalar_select %p584_p0, 1, 0 }
  0x1e   : > { %s113_s17 = sand.u32 1, %s486_s11   ;;  %p595_p6 = por %p93_p2, %p92_p1 }
  0x1f   : > { %s285_s19 = sshll.u32 %s113_s17, 3  ;;  %s289_s20 = sshll.u32 %s729_s24, 7 }
  0x20   : > { %s712_s18 = scalar_select %p595_p6, 1, 0 }
  0x21   : > { %s603_s22 = scalar_lea.hbm %s706_s0, %s289_s20  ;;  %s117_s23 = scalar_lea.vmem [#allocation2], %s285_s19 }
  0x22   : > { %s137_s14 = sshll.u32 %s117_s23, 4  ;;  %p607_p7 = pnand %p309_p4, %p557_p5  ;;  %s611_s14 = int_to_ptr.vmem [resolvable:$true] %s137_s14 }
  0x23   : > { %s114_s24 = scalar_lea.sflag [#allocation3], %s113_s17  ;;  %s370_s26 = scalar_lea.hbm %s603_s22, 128 }
  0x24   : > { %p371_p11 = scmp.ne.s32.totalorder %s603_s22, %s370_s26  ;;  %p372_p12 = pneg %p607_p7 }
  0x25   : > { %s375_s30 = scalar_lea.hbm %s706_s0, 256  ;;  %p376_p5 = scmp.lt.u32.totalorder %s603_s22, %s706_s0 }
  0x26   : > { %p373_p13 = pnand %p372_p12, %p371_p11  ;;  %p377_p2 = scmp.lt.u32.totalorder %s375_s30, %s370_s26 }
  0x27   : > { %p379_p3 = scmp.lt.u32.totalorder %s370_s26, %s603_s22 }
  0x28   : > { %p374_p1 = pneg %p373_p13  ;;  %p378_p4 = por %p377_p2, %p376_p5 }
  0x2a   : > { %p380_p8 = por %p379_p3, %p378_p4 }
  0x2c   : > { %p381_p10 = pnand %p380_p8, %p374_p1 }
  0x2e   : > { %384 = shalt.err (!%p381_p10)
}
  0x2f   : > { %s385_s17 = scalar_lea.vmem %s611_s14, 128  ;;  %s492_s19 = smov [#allocation2]  }
  0x30   : > { %p386_p11 = scmp.ne.s32.totalorder %s611_s14, %s385_s17  ;;  %s390_s20 = sshll.u32 %s492_s19, 4  ;;  %s391_s20 = int_to_ptr.vmem [resolvable:$false] %s390_s20 }
  0x31   : > { %s392_s21 = scalar_lea.vmem %s391_s20, 256  ;;  %p393_p0 = scmp.lt.s32.totalorder %s611_s14, %s391_s20 }
  0x32   : > { %p388_p13 = pnand %p386_p11, %p372_p12  ;;  %p394_p5 = scmp.lt.s32.totalorder %s392_s21, %s385_s17 }
  0x34   : > { %p389_p6 = pneg %p388_p13  ;;  %p395_p2 = por %p394_p5, %p393_p0 }
  0x36   : > { %p396_p3 = pnand %p395_p2, %p389_p6 }
  0x38   : > { %399 = shalt.err (!%p396_p3)
}
  0x39   : > { %304 = dma.hbm_to_vmem [thread:$0]  (!%p607_p7), %s603_s22, 128, %s611_s14, %s114_s24  }
  0x3a   : > { %p714_p8 = scmp.lt.s32.totalorder %s490_s12, 3  ;;  %p715_p10 = scmp.ge.s32.totalorder %s490_s12, 1 }
  0x3c   : > { %p143_p12 = pnand %p715_p10, %p714_p8 }
  0x3d   : > { %s148_s16 = sand.u32 (!%p143_p12), 1, %s482_s10  }
  0x3e   : > { %146 = sbr.rel (%p143_p12) target bundleno = 217 (0xd9), region = 24  ;;  %s291_s23 = sshll.u32 (!%p143_p12), %s148_s16, 3 }
  0x3f   : > { %s149_s26 = scalar_lea.sflag (!%p143_p12), [#allocation3], %s148_s16  ;;  %s152_s27 = scalar_lea.vmem (!%p143_p12), [#allocation2], %s291_s23 }
  0x45   : > { %457 = dma.done.wait (%p565_p9), %s149_s26, 128  }
  0x46   : > { %459 = vsyncadd (%p565_p9), %s149_s26, 4294967168  ;;  %v184_v0 = vld [vmem:[%s152_s27] sm:$0xff]  ;;  %s493_s22 = smov 64   ;;  %s168_s14 = sand.u32 1, %s470_s7  }
  0x47   : > { %v185_v1 = vmul.f32 2.5, %v184_v0  ;;  %s292_s25 = sshll.u32 %s168_s14, 3  ;;  %s294_s30 = sshll.u32 %s541_s13, 7 }
  0x48   : > { %s170_s24 = scalar_lea.vmem [#allocation5], %s292_s25  ;;  %s656_s3 = scalar_lea.hbm %s707_s1, %s294_s30 }
  0x49   : > { %368 = vtanh.f32 %v185_v1  ;;  %s206_s28 = sshll.u32 %s170_s24, 4  ;;  %s193_s17 = scalar_lea.sflag [#allocation4], %s168_s14  ;;  %s651_s28 = int_to_ptr.vmem [resolvable:$true] %s206_s28 }
  0x4a   : > { %s400_s19 = scalar_lea.vmem %s651_s28, 128  ;;  %p716_p0 = scmp.ne.s32.totalorder %s711_s9, 0 }
  0x4b   : > { %p401_p9 = scmp.ne.s32.totalorder %s651_s28, %s400_s19  ;;  %s494_s20 = smov [#allocation5]  }
  0x4c   : > { %s404_s13 = sshll.u32 %s494_s20, 4  ;;  %s405_s13 = int_to_ptr.vmem [resolvable:$false] %s404_s13 }
  0x4d   : > { %p402_p6 = pnand %p401_p9, %p716_p0  ;;  %s406_s21 = scalar_lea.vmem %s405_s13, 256 }
  0x4e   : > { %p407_p1 = scmp.lt.s32.totalorder %s651_s28, %s405_s13  ;;  %p408_p4 = scmp.lt.s32.totalorder %s406_s21, %s400_s19 }
  0x4f   : > { %p403_p7 = pneg %p402_p6 }
  0x50   : > { %p409_p11 = por %p408_p4, %p407_p1 }
  0x52   : > { %p410_p13 = pnand %p409_p11, %p403_p7 }
  0x53   : > { %v369_v2 = vpop.eup %368 }
  0x54   : > { %v187_v3 = vmul.f32 0.5, %v369_v2 }
  0x56   : > { %v188_v4 = vadd.f32 0.5, %v187_v3 }
  0x58   : > { %189 = vrot.lane.b32.xlu0 %v188_v4, %s493_s22 }
  0xca   : > { %v190_v5 = vpop.permute.xlu0 %189 }
  0xcb   : > { %191 = vst [vmem:[%s170_s24] sm:$0xff] %v190_v5 }
  0xcc   : > { %413 = shalt.err (!%p410_p13)
}
  0xcd   : > { %s414_s16 = scalar_lea.hbm %s656_s3, 128  ;;  %s418_s27 = scalar_lea.hbm %s707_s1, 256 }
  0xce   : > { %p415_p5 = scmp.ne.s32.totalorder %s656_s3, %s414_s16  ;;  %p419_p8 = scmp.lt.u32.totalorder %s656_s3, %s707_s1 }
  0xcf   : > { %p420_p10 = scmp.lt.u32.totalorder %s418_s27, %s414_s16  ;;  %p422_p9 = scmp.lt.u32.totalorder %s414_s16, %s656_s3 }
  0xd0   : > { %p416_p2 = pnand %p415_p5, %p716_p0 }
  0xd1   : > { %p421_p12 = por %p420_p10, %p419_p8 }
  0xd2   : > { %p417_p3 = pneg %p416_p2 }
  0xd3   : > { %p423_p6 = por %p422_p9, %p421_p12 }
  0xd5   : > { %p424_p7 = pnand %p423_p6, %p417_p3 }
  0xd7   : > { %427 = shalt.err (!%p424_p7)
}
  0xd8   : > { %299 = dma.vmem_to_hbm [thread:$0]  (%p716_p0), %s651_s28, 128, %s656_s3, %s193_s17  }
  0xd9 PF: > { %s218_s25 = sand.u32 1, %s466_s6   ;;  %p717_p1 = scmp.ne.s32.totalorder %s712_s18, 0 }
  0xda   : > { %p718_p4 = scmp.ge.s32.totalorder %s490_s12, 2  ;;  %s219_s24 = scalar_lea.sflag [#allocation4], %s218_s25 }
  0xdc   : > { %p306_p11 = pnand %p718_p4, %p717_p1 }
  0xde   : > { %461 = dma.done.wait (!%p306_p11), %s219_s24, 128  }
  0xdf   : > { %463 = vsyncadd (!%p306_p11), %s219_s24, 4294967168  ;;  %p14_p0 = scmp.ge.s32.totalorder %s545_s15, 4   ;;  %s719_s6 = smov %s470_s7 }
  0xe0   : > { %s720_s7 = smov %s474_s8  ;;  %s721_s8 = smov %s577_s4 }
  0xe1   : > { %s722_s9 = smov %s482_s10  ;;  %s723_s10 = smov %s486_s11 }
  0xe2   : > { %s724_s11 = smov %s582_s5  ;;  %s725_s12 = smov %s545_s15 }
  0xe3   :  { %16 = sbr.rel (!%p14_p0) target bundleno = 7 (0x7), region = 69 }
  0xea   :  { %224 = vsyncpa [#allocation3], 1 }
  0xeb   :  { %226 = vsyncpa [#allocation3 + $0x1], 1 }
  0xec   :  { %227 = vsyncpa [#allocation4], 1 }
  0xed   :  { %229 = vsyncpa [#allocation4 + $0x1], 1 }

</bundles_post_ra>
